<compile_context>
chip_gen: v6e
topology: v6e:2x2x1
jax: 0.10.0
libtpu: 0.0.40
codegen_flags: <defaults>
</compile_context>

<pallas_src>
import functools

import jax
import jax.numpy as jnp
from jax.experimental import pallas as pl
from jax.experimental.pallas import tpu as pltpu


def _poly1_focal_kernel(logits_ref, labels_ref, out_ref, acc_ref, *,
                        epsilon, alpha, gamma, packed, spatial_extent,
                        spatial_tile, num_blocks, blocks_per_core, has_dummy):
    """Accumulates sum(poly1 focal loss) over one (core, batch, spatial) block."""
    p = pl.program_id(0)          # TensorCore split (CORE_PARALLEL when >1 core)
    n = pl.program_id(1)          # batch          (reduction, arbitrary)
    s = pl.program_id(2)          # spatial block  (reduction, arbitrary)

    @pl.when((n == 0) & (s == 0))
    def _():
        acc_ref[...] = jnp.zeros_like(acc_ref)

    j = p * blocks_per_core + s   # global (unclamped) spatial block id

    def accumulate(mask_tail):
        x = logits_ref[...].astype(jnp.float32)      # (C, st, 128) or (C, hw_tile)
        lab = labels_ref[...].astype(jnp.int32)      # (1, st, 128) or (1, hw_tile)

        # One-hot as a boolean mask: class iota on the leading axis vs labels.
        cls = jax.lax.broadcasted_iota(jnp.int32, x.shape, 0)
        y = cls == lab                               # bool, broadcasts over axis 0

        # Signed-logit identity: z = +x for the true class, -x otherwise.
        z = jnp.where(y, x, -x)
        t = jnp.exp(-jnp.abs(x))                     # = exp(-|z|)
        ce = jnp.maximum(-z, 0.0) + jnp.log1p(t)     # stable BCE-with-logits
        pt = jnp.exp(-ce)                            # = sigmoid(z) = pt
        omp = 1.0 - pt                               # = 1 - pt

        g = float(gamma)
        if g.is_integer() and 0 <= int(g) <= 8:
            gi = int(g)
            omp_g = jnp.ones_like(omp) if gi == 0 else omp
            for _ in range(max(gi - 1, 0)):
                omp_g = omp_g * omp                  # (1-pt)**gamma via multiplies
        else:
            omp_g = jnp.power(omp, g)
        omp_g1 = omp_g * omp                         # (1-pt)**(gamma+1)

        fl = ce * omp_g
        if alpha >= 0:
            fl = jnp.where(y, jnp.float32(alpha), jnp.float32(1.0 - alpha)) * fl
        poly1 = fl + jnp.float32(epsilon) * omp_g1

        if packed:
            # Leading-axis (class) reduce: C-1 plain vector adds, no XLU.
            part = jnp.sum(poly1, axis=0)            # (st, 128)
            if mask_tail:
                row = jax.lax.broadcasted_iota(jnp.int32, part.shape, 0)
                part = jnp.where(j * spatial_tile + row < spatial_extent,
                                 part, 0.0)
            acc_ref[...] += part
        else:
            if mask_tail:
                col = jax.lax.broadcasted_iota(jnp.int32, poly1.shape, 1)
                poly1 = jnp.where(j * spatial_tile + col < spatial_extent,
                                  poly1, 0.0)
            acc_ref[...] += poly1

    ragged = (spatial_extent % spatial_tile) != 0
    if ragged:
        # Only the last real block pays for the boundary mask.
        @pl.when(j == num_blocks - 1)
        def _():
            accumulate(True)

        @pl.when(j < num_blocks - 1)
        def _():
            accumulate(False)
    elif has_dummy:
        # Skip the clamped dummy block(s) entirely (multi-core, uneven split).
        @pl.when(j < num_blocks)
        def _():
            accumulate(False)
    else:
        accumulate(False)

    @pl.when((n == pl.num_programs(1) - 1) & (s == pl.num_programs(2) - 1))
    def _():
        out_ref[...] = jnp.sum(acc_ref[...], axis=(0, 1), keepdims=True)


def _detect_num_tensorcores():
    """Best-effort TensorCores-per-chip query (2 on v7x, 1 on v5e/v6e)."""
    try:
        info = pltpu.get_tpu_info()
    except Exception:
        return 1
    for name in ("num_tensorcores", "tensorcore_count", "num_cores", "core_count"):
        v = getattr(info, name, None)
        if isinstance(v, int) and v >= 1:
            return min(v, 2)
    return 1


def poly1_focal_loss(logits, labels, *, num_classes, epsilon=1.0, alpha=0.25,
                     gamma=2.0, reduction="mean", weight=None, pos_weight=None,
                     label_is_onehot=False, num_cores=None):
    """Poly-1 focal loss.  logits: [N, C, ...] float; labels: [N, ...] int ids."""
    # TODO(synk): per-class `weight` / `pos_weight` BCE rescaling not implemented.
    if weight is not None or pos_weight is not None:
        raise NotImplementedError("weight / pos_weight are not supported")
    # TODO(synk): one-hot encoded labels path (label_is_onehot=True) not implemented.
    if label_is_onehot:
        raise NotImplementedError("label_is_onehot=True is not supported")
    if reduction not in ("mean", "sum"):
        # TODO(synk): reduction='none' needs the full [N, C, ...] loss-map output.
        raise NotImplementedError("only 'mean' and 'sum' reductions supported")

    N, C = logits.shape[0], logits.shape[1]
    assert C == num_classes
    HW = 1
    for d in logits.shape[2:]:
        HW *= int(d)

    if labels.dtype != jnp.int32:
        # TODO(synk): keep int8/int16 labels end-to-end to trim HBM traffic on v5e.
        labels = labels.astype(jnp.int32)

    itemsize = jnp.dtype(logits.dtype).itemsize
    budget = 4 << 20                          # ~4 MiB of logits per block

    S = HW // 128
    packed = (HW % 128 == 0) and (S >= 8)

    if packed:
        # Free view: spatial lane- and sublane-dense, class axis leading.
        logits_v = logits.reshape(N, C, S, 128)
        labels_v = labels.reshape(N, 1, S, 128)
        s_target = max(8, ((budget // (C * 128 * itemsize)) // 8) * 8)
        spatial_tile = S if s_target >= S else s_target
        num_blocks = pl.cdiv(S, spatial_tile)
        spatial_extent = S
        blk_cols = spatial_tile * 128
        acc_shape = (spatial_tile, 128)       # class axis reduced per step
        blk_shape_x = (None, C, spatial_tile, 128)
        blk_shape_l = (None, 1, spatial_tile, 128)
    else:
        # Fallback: spatial lane-dense, classes on sublanes.
        logits_v = logits.reshape(N, C, HW)
        labels_v = labels.reshape(N, 1, HW)
        cols = max(128, ((budget // (C * itemsize)) // 128) * 128)
        spatial_tile = HW if cols >= HW else cols
        num_blocks = pl.cdiv(HW, spatial_tile)
        spatial_extent = HW
        blk_cols = spatial_tile
        acc_shape = (C, spatial_tile)
        blk_shape_x = (None, C, spatial_tile)
        blk_shape_l = (None, 1, spatial_tile)

    # Double-buffered logits + labels blocks, resident f32 accumulator, headroom.
    need = (2 * (C * blk_cols * itemsize + blk_cols * 4)
            + acc_shape[0] * acc_shape[1] * 4)
    vmem_limit = int(min(48 << 20, max(need + (8 << 20), 24 << 20)))

    if num_cores is None:
        num_cores = _detect_num_tensorcores()
    num_cores = max(1, min(int(num_cores), num_blocks))

    def run(cores):
        bpc = pl.cdiv(num_blocks, cores)
        has_dummy = cores * bpc > num_blocks
        grid = (cores, N, bpc)

        def data_map(p, n, s):
            jj = jnp.minimum(p * bpc + s, num_blocks - 1)
            if packed:
                return (n, 0, jj, 0)
            return (n, 0, jj)

        kernel = functools.partial(
            _poly1_focal_kernel,
            epsilon=float(epsilon), alpha=float(alpha), gamma=float(gamma),
            packed=packed, spatial_extent=spatial_extent,
            spatial_tile=spatial_tile, num_blocks=num_blocks,
            blocks_per_core=bpc, has_dummy=has_dummy)

        core_sem = (getattr(pltpu, "CORE_PARALLEL", "parallel")
                    if cores > 1 else "arbitrary")

        return pl.pallas_call(
            kernel,
            out_shape=jax.ShapeDtypeStruct((cores, 1, 1), jnp.float32),
            grid_spec=pltpu.PrefetchScalarGridSpec(
                num_scalar_prefetch=0,
                grid=grid,
                in_specs=[pl.BlockSpec(blk_shape_x, data_map),
                          pl.BlockSpec(blk_shape_l, data_map)],
                out_specs=pl.BlockSpec((None, 1, 1), lambda p, n, s: (p, 0, 0)),
                scratch_shapes=[pltpu.VMEM(acc_shape, jnp.float32)],
            ),
            compiler_params=pltpu.CompilerParams(
                dimension_semantics=(core_sem, "arbitrary", "arbitrary"),
                vmem_limit_bytes=vmem_limit),
        )(logits_v, labels_v)

    try:
        partials = run(num_cores)
    except Exception:
        if num_cores <= 1:
            raise
        partials = run(1)        # conservative single-core fallback

    total = jnp.sum(partials)
    if reduction == "mean":
        total = total / jnp.float32(N * C * HW)
    # Note: downcasts the scalar loss to bf16 when logits are bf16 (torch dtype flow).
    return total.astype(logits.dtype)


def _reference(logits, labels, *, num_classes, epsilon=1.0, alpha=0.25, gamma=2.0):
    x = logits.astype(jnp.float32)
    y = jax.nn.one_hot(labels, num_classes, axis=1, dtype=jnp.float32)
    p = jax.nn.sigmoid(x)
    ce = jnp.maximum(x, 0.0) - x * y + jnp.log1p(jnp.exp(-jnp.abs(x)))
    pt = y * p + (1 - y) * (1 - p)
    fl = ce * (1 - pt) ** gamma
    alpha_t = alpha * y + (1 - alpha) * (1 - y)
    fl = alpha_t * fl
    poly1 = fl + epsilon * (1 - pt) ** (gamma + 1)
    return jnp.mean(poly1)


if __name__ == "__main__":
    key = jax.random.PRNGKey(0)
    k1, k2, k3, k4 = jax.random.split(key, 4)

    # Case 1: spec-like small shapes (H*W = 256 -> 2-D fallback layout).
    N, C, H, W = 2, 4, 16, 16
    logits = jax.random.normal(k1, (N, C, H, W), dtype=jnp.float32)
    labels = jax.random.randint(k2, (N, H, W), 0, C, dtype=jnp.int32)
    out = jax.block_until_ready(poly1_focal_loss(logits, labels, num_classes=C))
    ref = _reference(logits, labels, num_classes=C)
    assert jnp.allclose(out, ref, rtol=2e-5, atol=1e-6), (out, ref)

    # Case 2: H*W = 1024 (multiple of 128, >= 8 rows) -> packed 4-D layout.
    N2, C2, H2, W2 = 2, 4, 32, 32
    logits2 = jax.random.normal(k3, (N2, C2, H2, W2), dtype=jnp.float32)
    labels2 = jax.random.randint(k4, (N2, H2, W2), 0, C2, dtype=jnp.int32)
    out2 = jax.block_until_ready(poly1_focal_loss(logits2, labels2, num_classes=C2))
    ref2 = _reference(logits2, labels2, num_classes=C2)
    assert jnp.allclose(out2, ref2, rtol=2e-5, atol=1e-6), (out2, ref2)

    print("KERNEL_OK")
</pallas_src>

<mosaic_0001>
module attributes {stable_mosaic.version = 11 : i64} {
  func.func @_poly1_focal_kernel(%arg0: i32, %arg1: i32, %arg2: i32, %arg3: memref<1x4x256xf32, #tpu.memory_space<vmem>>, %arg4: memref<1x1x256xi32, #tpu.memory_space<vmem>>, %arg5: memref<1x1x1xf32, #tpu.memory_space<vmem>>, %arg6: memref<4x256xf32, #tpu.memory_space<vmem>>) attributes {dimension_semantics = [#tpu.dimension_semantics<arbitrary>, #tpu.dimension_semantics<arbitrary>, #tpu.dimension_semantics<arbitrary>], iteration_bounds = array<i64: 1, 2, 1>, scalar_prefetch = 0 : i64, scratch_operands = 1 : i64, tpu.core_type = #tpu.core_type<tc>, window_params = [{transform_indices = @transform_0, window_bounds = array<i64: 1, 4, 256>}, {transform_indices = @transform_1, window_bounds = array<i64: 1, 1, 256>}, {transform_indices = @transform_2, window_bounds = array<i64: 1, 1, 1>}]} {
    %c0_i32 = arith.constant 0 : i32
    %0 = arith.cmpi eq, %arg1, %c0_i32 : i32
    %c0_i32_0 = arith.constant 0 : i32
    %1 = arith.cmpi eq, %arg2, %c0_i32_0 : i32
    %2 = arith.andi %0, %1 : i1
    %3 = arith.extui %2 : i1 to i32
    %c0_i32_1 = arith.constant 0 : i32
    %4 = arith.cmpi ne, %3, %c0_i32_1 : i32
    scf.if %4 {
      %cst_21 = arith.constant 0.000000e+00 : f32
      %48 = vector.broadcast %cst_21 : f32 to vector<4x256xf32>
      %c0_22 = arith.constant 0 : index
      %c0_23 = arith.constant 0 : index
      %49 = vector.load %arg6[%c0_22, %c0_23] : memref<4x256xf32, #tpu.memory_space<vmem>>, vector<4x256xf32>
      tpu.vector_store %arg6[%c0_22, %c0_23], %48 {strides = array<i32>} : memref<4x256xf32, #tpu.memory_space<vmem>>, vector<4x256xf32>,
    } else {
    }
    %c0 = arith.constant 0 : index
    %c0_2 = arith.constant 0 : index
    %c0_3 = arith.constant 0 : index
    %5 = vector.load %arg3[%c0, %c0_2, %c0_3] : memref<1x4x256xf32, #tpu.memory_space<vmem>>, vector<1x4x256xf32>
    %6 = vector.shape_cast %5 : vector<1x4x256xf32> to vector<4x256xf32>
    %c0_4 = arith.constant 0 : index
    %c0_5 = arith.constant 0 : index
    %c0_6 = arith.constant 0 : index
    %7 = vector.load %arg4[%c0_4, %c0_5, %c0_6] : memref<1x1x256xi32, #tpu.memory_space<vmem>>, vector<1x1x256xi32>
    %8 = vector.shape_cast %7 : vector<1x1x256xi32> to vector<1x256xi32>
    %9 = tpu.iota {dimensions = array<i32: 0>} : vector<4x256xi32>
    %10 = vector.broadcast %8 : vector<1x256xi32> to vector<4x256xi32>
    %11 = arith.cmpi eq, %9, %10 : vector<4x256xi32>
    %cst = arith.constant 0.000000e+00 : f32
    %12 = vector.broadcast %cst : f32 to vector<4x256xf32>
    %13 = arith.subf %12, %6 : vector<4x256xf32>
    %14 = arith.select %11, %6, %13 : vector<4x256xi1>, vector<4x256xf32>
    %15 = math.absf %6 : vector<4x256xf32>
    %cst_7 = arith.constant 0.000000e+00 : f32
    %16 = vector.broadcast %cst_7 : f32 to vector<4x256xf32>
    %17 = arith.subf %16, %15 : vector<4x256xf32>
    %18 = math.exp %17 : vector<4x256xf32>
    %cst_8 = arith.constant 0.000000e+00 : f32
    %19 = vector.broadcast %cst_8 : f32 to vector<4x256xf32>
    %20 = arith.subf %19, %14 : vector<4x256xf32>
    %cst_9 = arith.constant 0.000000e+00 : f32
    %21 = vector.broadcast %cst_9 : f32 to vector<4x256xf32>
    %22 = arith.maximumf %20, %21 : vector<4x256xf32>
    %23 = math.log1p %18 : vector<4x256xf32>
    %24 = arith.addf %22, %23 : vector<4x256xf32>
    %cst_10 = arith.constant 0.000000e+00 : f32
    %25 = vector.broadcast %cst_10 : f32 to vector<4x256xf32>
    %26 = arith.subf %25, %24 : vector<4x256xf32>
    %27 = math.exp %26 : vector<4x256xf32>
    %cst_11 = arith.constant 1.000000e+00 : f32
    %28 = vector.broadcast %cst_11 : f32 to vector<4x256xf32>
    %29 = arith.subf %28, %27 : vector<4x256xf32>
    %30 = arith.mulf %29, %29 : vector<4x256xf32>
    %31 = arith.mulf %30, %29 : vector<4x256xf32>
    %32 = arith.mulf %24, %30 : vector<4x256xf32>
    %cst_12 = arith.constant 2.500000e-01 : f32
    %cst_13 = arith.constant 7.500000e-01 : f32
    %33 = vector.broadcast %cst_12 : f32 to vector<4x256xf32>
    %34 = vector.broadcast %cst_13 : f32 to vector<4x256xf32>
    %35 = arith.select %11, %33, %34 : vector<4x256xi1>, vector<4x256xf32>
    %36 = arith.mulf %35, %32 : vector<4x256xf32>
    %cst_14 = arith.constant 1.000000e+00 : f32
    %37 = vector.broadcast %cst_14 : f32 to vector<4x256xf32>
    %38 = arith.mulf %37, %31 : vector<4x256xf32>
    %39 = arith.addf %36, %38 : vector<4x256xf32>
    %c0_15 = arith.constant 0 : index
    %c0_16 = arith.constant 0 : index
    %40 = vector.load %arg6[%c0_15, %c0_16] : memref<4x256xf32, #tpu.memory_space<vmem>>, vector<4x256xf32>
    %41 = arith.addf %40, %39 : vector<4x256xf32>
    %c0_17 = arith.constant 0 : index
    %c0_18 = arith.constant 0 : index
    %42 = vector.load %arg6[%c0_17, %c0_18] : memref<4x256xf32, #tpu.memory_space<vmem>>, vector<4x256xf32>
    tpu.vector_store %arg6[%c0_17, %c0_18], %41 {strides = array<i32>} : memref<4x256xf32, #tpu.memory_space<vmem>>, vector<4x256xf32>,
    %c1_i32 = arith.constant 1 : i32
    %43 = arith.cmpi eq, %arg1, %c1_i32 : i32
    %c0_i32_19 = arith.constant 0 : i32
    %44 = arith.cmpi eq, %arg2, %c0_i32_19 : i32
    %45 = arith.andi %43, %44 : i1
    %46 = arith.extui %45 : i1 to i32
    %c0_i32_20 = arith.constant 0 : i32
    %47 = arith.cmpi ne, %46, %c0_i32_20 : i32
    scf.if %47 {
      %c0_21 = arith.constant 0 : index
      %c0_22 = arith.constant 0 : index
      %48 = vector.load %arg6[%c0_21, %c0_22] : memref<4x256xf32, #tpu.memory_space<vmem>>, vector<4x256xf32>
      %49 = vector.shape_cast %48 : vector<4x256xf32> to vector<1x4x256xf32>
      %cst_23 = arith.constant dense<0.000000e+00> : vector<1xf32>
      %50 = vector.multi_reduction <add>, %49, %cst_23 [1, 2] : vector<1x4x256xf32> to vector<1xf32>
      %51 = vector.shape_cast %50 : vector<1xf32> to vector<1x1x1xf32>
      %52 = vector.extract %51[0, 0, 0] : f32 from vector<1x1x1xf32>
      %53 = vector.broadcast %52 : f32 to vector<1x1xf32>
      %c0_24 = arith.constant 0 : index
      %c0_25 = arith.constant 0 : index
      %c0_26 = arith.constant 0 : index
      %54 = vector.load %arg5[%c0_24, %c0_25, %c0_26] : memref<1x1x1xf32, #tpu.memory_space<vmem>>, vector<1x1x1xf32>
      %55 = vector.shape_cast %54 : vector<1x1x1xf32> to vector<1x1xf32>
      %56 = vector.shape_cast %53 : vector<1x1xf32> to vector<1x1x1xf32>
      tpu.vector_store %arg5[%c0_24, %c0_25, %c0_26], %56 {strides = array<i32>} : memref<1x1x1xf32, #tpu.memory_space<vmem>>, vector<1x1x1xf32>,
    } else {
    }
    return
  }
  func.func @transform_0(%arg0: i32, %arg1: i32, %arg2: i32) -> (i32, i32, i32) {
    %c1_i32 = arith.constant 1 : i32
    %0 = arith.muli %arg0, %c1_i32 : i32
    %1 = arith.addi %0, %arg2 : i32
    %c0_i32 = arith.constant 0 : i32
    %2 = arith.minsi %1, %c0_i32 : i32
    %c0_i32_0 = arith.constant 0 : i32
    %c0_i32_1 = arith.constant 0 : i32
    return %arg1, %c0_i32_0, %2 : i32, i32, i32
  }
  func.func @transform_1(%arg0: i32, %arg1: i32, %arg2: i32) -> (i32, i32, i32) {
    %c1_i32 = arith.constant 1 : i32
    %0 = arith.muli %arg0, %c1_i32 : i32
    %1 = arith.addi %0, %arg2 : i32
    %c0_i32 = arith.constant 0 : i32
    %2 = arith.minsi %1, %c0_i32 : i32
    %c0_i32_0 = arith.constant 0 : i32
    %c0_i32_1 = arith.constant 0 : i32
    return %arg1, %c0_i32_0, %2 : i32, i32, i32
  }
  func.func @transform_2(%arg0: i32, %arg1: i32, %arg2: i32) -> (i32, i32, i32) {
    %c0_i32 = arith.constant 0 : i32
    %c0_i32_0 = arith.constant 0 : i32
    %c0_i32_1 = arith.constant 0 : i32
    return %arg0, %c0_i32, %c0_i32_0 : i32, i32, i32
  }
}

</mosaic_0001>

<bundles_post_ra>
// kernel: tpu_custom_call.1
= control target key start
LH: loop header
LB: loop body
LE: loop exit
PB: predicated region body
PF: predicated region fallthrough
CT: control target
= control target key end

     0   :  { %7 = vsyncpa [#allocation4], 0  ;;  %s863_s0 = inlined_call_operand.hbm [shape: f32[2,4,256], index: 0, kind: input, shape index: {}]   ;;  %s864_s1 = inlined_call_operand.hbm [shape: s32[2,1,256], index: 1, kind: input, shape index: {}]   ;;  %s865_s2 = inlined_call_operand.hbm [shape: f32[1,1,1], index: 2, kind: output, shape index: {}]  }
   0x1   :  { %9 = vsyncpa [#allocation4 + $0x1], 0 }
   0x2   :  { %10 = vsyncpa [#allocation7], 0 }
   0x3   :  { %12 = vsyncpa [#allocation7 + $0x1], 0 }
   0x4   :  { %13 = vsyncpa [#allocation5], 0  ;;  %s713_s9 = smov 0   ;;  %s715_s10 = smov 0  }
   0x5   :  { %s717_s11 = smov 0   ;;  %s719_s12 = smov 0  }
   0x6   :  { %s721_s13 = smov 0   ;;  %s723_s14 = smov 0  }
   0x7 LB: > { %s450_s15 = sadd.s32 4294967295, %s691_s14   ;;  %s34_s16 = sadd.s32 1, %s687_s13  ;;  %s691_s14 = sphi %s723_s14, %s19_s14   ;;  %s687_s13 = sphi %s721_s13, %s875_s13   ;;  %s683_s12 = sphi %s719_s12, %s874_s12   ;;  %s679_s11 = sphi %s717_s11, %s873_s11   ;;  %s675_s10 = sphi %s715_s10, %s872_s10   ;;  %s671_s9 = sphi %s713_s9, %s871_s9  }
   0x8   : > { %p36_p0 = scmp.ge.s32.totalorder %s34_s16, 2  ;;  %s53_s17 = sadd.s32 1, %s679_s11 }
   0x9   : > { %p60_p1 = scmp.ne.s32.totalorder %s679_s11, %s675_s10  ;;  %p61_p2 = scmp.eq.s32.totalorder %s691_s14, 0 }
   0xa   : > { %s877_s16 = smov (%p36_p0, %s34_s16), 0  ;;  %p66_p4 = scmp.ne.s32.totalorder %s675_s10, %s671_s9 }
   0xb   : > { %p749_p3 = por %p61_p2, %p60_p1  ;;  %s48_s19 = ssub.s32 %s687_s13, %s877_s16 }
   0xc   : > { %p67_p5 = scmp.eq.s32.totalorder %s450_s15, 0  ;;  %p51_p6 = scmp.eq.s32.totalorder %s48_s19, 0 }
   0xd   : > { %p489_p8 = scmp.lt.s32.totalorder %s691_s14, 2  ;;  %s767_s22 = sand.u32 1, %s679_s11  }
   0xe   : > { %p758_p7 = por %p67_p5, %p66_p4  ;;  %s468_s23 = sshll.u32 %s687_s13, 7 }
   0xf   : > { %s764_s21 = scalar_select %p51_p6, %s679_s11, %s53_s17  }
  0x10   : > { %s453_s24 = sshll.u32 %s767_s22, 3  ;;  %s165_s27 = scalar_lea.hbm %s863_s0, %s468_s23 }
  0x11   : > { %s154_s28 = scalar_lea.vmem [#allocation3], %s453_s24  ;;  %p776_p9 = pnand %p489_p8, %p749_p3 }
  0x12   : > { %s167_s29 = sshll.u32 %s154_s28, 4  ;;  %p459_p10 = scmp.ge.s32.totalorder %s691_s14, 1  ;;  %s168_s29 = int_to_ptr.vmem [resolvable:$true] %s167_s29 }
  0x13   : > { %p196_p11 = scmp.lt.s32.totalorder %s691_s14, 3  ;;  %s151_s3 = scalar_lea.sflag [#allocation4], %s767_s22 }
  0x14   : > { %p555_p12 = pneg %p776_p9  ;;  %s566_s4 = scalar_lea.vmem %s168_s29, 128 }
  0x15   : > { %p567_p13 = scmp.ne.s32.totalorder %s168_s29, %s566_s4  ;;  %s693_s5 = smov [#allocation3]  }
  0x16   : > { %s571_s6 = sshll.u32 %s693_s5, 4  ;;  %s572_s6 = int_to_ptr.vmem [resolvable:$false] %s571_s6 }
  0x17   : > { %p569_p0 = pnand %p567_p13, %p555_p12  ;;  %s573_s7 = scalar_lea.vmem %s572_s6, 256 }
  0x18   : > { %p574_p2 = scmp.lt.s32.totalorder %s168_s29, %s572_s6  ;;  %p575_p3 = scmp.lt.s32.totalorder %s573_s7, %s566_s4 }
  0x19   : > { %p570_p1 = pneg %p569_p0 }
  0x1a   : > { %p576_p4 = por %p575_p3, %p574_p2 }
  0x1c   : > { %p577_p5 = pnand %p576_p4, %p570_p1 }
  0x1e   : > { %580 = shalt.err (!%p577_p5)
}
  0x1f   : > { %485 = dma.hbm_to_vmem [thread:$0]  (!%p776_p9), %s165_s27, 128, %s168_s29, %s151_s3  }
  0x20   : > { %p794_p6 = pnand %p459_p10, %p196_p11  ;;  %s456_s9 = sshll.u32 %s767_s22, 1 }
  0x21   : > { %s469_s17 = sshll.u32 %s687_s13, 5  ;;  %s178_s24 = scalar_lea.vmem [#allocation6], %s456_s9 }
  0x22   : > { %s189_s23 = scalar_lea.hbm %s864_s1, %s469_s17  ;;  %s191_s25 = sshll.u32 %s178_s24, 4  ;;  %s192_s25 = int_to_ptr.vmem [resolvable:$true] %s191_s25 }
  0x23   : > { %s175_s26 = scalar_lea.sflag [#allocation7], %s767_s22  ;;  %s594_s28 = scalar_lea.vmem %s192_s25, 32 }
  0x24   : > { %p595_p8 = scmp.ne.s32.totalorder %s192_s25, %s594_s28  ;;  %s694_s27 = smov [#allocation6]  }
  0x25   : > { %s599_s29 = sshll.u32 %s694_s27, 4  ;;  %s600_s29 = int_to_ptr.vmem [resolvable:$false] %s599_s29 }
  0x26   : > { %p597_p13 = pnand %p595_p8, %p555_p12  ;;  %s601_s3 = scalar_lea.vmem %s600_s29, 64 }
  0x27   : > { %p602_p10 = scmp.lt.s32.totalorder %s192_s25, %s600_s29  ;;  %p603_p11 = scmp.lt.s32.totalorder %s601_s3, %s594_s28 }
  0x28   : > { %p598_p0 = pneg %p597_p13 }
  0x29   : > { %p604_p1 = por %p603_p11, %p602_p10 }
  0x2b   : > { %p605_p2 = pnand %p604_p1, %p598_p0 }
  0x2d   : > { %608 = shalt.err (!%p605_p2)
}
  0x2e   : > { %488 = dma.hbm_to_vmem [thread:$0]  (!%p776_p9), %s189_s23, 32, %s192_s25, %s175_s26  }
  0x2f   : > { %200 = sbr.rel (%p794_p6) target bundleno = 369 (0x171), region = 28  ;;  %s202_s22 = sand.u32 (!%p794_p6), 1, %s675_s10  }
  0x30   : > { %s460_s4 = sshll.u32 (!%p794_p6), %s202_s22, 3  ;;  %s203_s5 = scalar_lea.sflag (!%p794_p6), [#allocation4], %s202_s22 }
  0x31   : > { %s206_s6 = scalar_lea.vmem (!%p794_p6), [#allocation3], %s460_s4 }
  0x34   : > { %658 = dma.done.wait (%p758_p7), %s203_s5, 128  }
  0x35   : > { %660 = vsyncadd (%p758_p7), %s203_s5, 4294967168  ;;  %s461_s7 = sshll.u32 %s202_s22, 1  ;;  %s212_s9 = scalar_lea.sflag [#allocation7], %s202_s22 }
  0x36   : > { %s215_s17 = scalar_lea.vmem [#allocation6], %s461_s7 }
  0x37   : > { %662 = dma.done.wait (%p758_p7), %s212_s9, 32  }
  0x38   : > { %664 = vsyncadd (%p758_p7), %s212_s9, 4294967264  ;;  %p244_p9 = scmp.eq.s32.totalorder %s683_s12, 0 }
  0x39   : > { %v695_v0 = vmov (%p244_p9), 0.0  }
  0x3a   : > { %249 = sbr.rel (!%p244_p9) target bundleno = 63 (0x3f), region = 40  ;;  %250 = vst [vmem:[#allocation2] sm:$0xff] (%p244_p9), %v695_v0 }
  0x3f PF: > { %v251_v1 = vld [vmem:[%s206_s6] sm:$0xff]  ;;  %p323_p12 = scmp.eq.s32.totalorder %s683_s12, 1  ;;  %v253_v5 = vlaneseq  ;;  %v252_v8 = vld [vmem:[%s215_s17] sm:$0x3]  ;;  %v696_v42 = vmov 0.75  }
  0x40   : > { %v274_v2 = vand.u32 2147483647, %v251_v1  ;;  %v265_v13 = vsub.f32 0.0, %v251_v1  ;;  %v267_v15 = vcombine.high %v251_v1, %v251_v1  ;;  %vm332_vm3 = vcmask (%p323_p12), 1043456  }
  0x41   : > { %v254_v6 = vshrl.u32 %v253_v5, 7  ;;  %v316_v54 = vld [vmem:[#allocation2] sm:$0xff]  ;;  %vm346_vm4 = vcmask (%p323_p12), 0  }
  0x42   : > { %v275_v3 = vsub.f32 0.0, %v274_v2  ;;  %v270_v16 = vcombine.high %v265_v13, %v265_v13 }
  0x43   : > { %v257_v7 = vsub.s32 0, %v254_v6  ;;  %v261_v10 = vsub.s32 1, %v254_v6 }
  0x44   : > { %v276_v4 = vmul.f32 1.442695, %v275_v3 }
  0x45   : > { %v258_v12 = vrot.slane %v252_v8, %v257_v7  ;;  %v262_v14 = vrot.slane %v252_v8, %v261_v10 }
  0x46   : > { %544 = vpow2.f32 %v276_v4 }
  0x47   : > { %vm263_vm0 = vcmp.eq.s32.totalorder %v254_v6, %v258_v12  ;;  %vm264_vm1 = vcmp.eq.s32.totalorder %v254_v6, %v262_v14 }
  0x48   : > { %v272_v18 = vsel %vm263_vm0, %v251_v1, %v265_v13  ;;  %v273_v19 = vsel %vm264_vm1, %v267_v15, %v270_v16  ;;  %v310_v43 = vsel %vm263_vm0, 0.25, %v696_v42  ;;  %v311_v47 = vsel %vm264_vm1, 0.25, %v696_v42 }
  0x49   : > { %v278_v21 = vsub.f32 0.0, %v272_v18  ;;  %v279_v23 = vsub.f32 0.0, %v273_v19 }
  0x4b   : > { %v280_v26 = vmax.f32 %v278_v21, 0.0  ;;  %v281_v28 = vmax.f32 %v279_v23, 0.0 }
  0x53   : > { %v545_v9 = vpop.eup %544 }
  0x54   : > { %v282_v11 = vadd.f32 1.0, %v545_v9  ;;  %v285_v17 = vmul.f32 -0.5, %v545_v9  ;;  %v288_v22 = vand.u32 2147483647, %v545_v9 }
  0x56   : > { %546 = vlog2.f32 %v282_v11  ;;  %v286_v20 = vadd.f32 1.0, %v285_v17  ;;  %vm289_vm2 = vcmp.lt.f32.partialorder %v288_v22, 0.0004427343 }
  0x58   : > { %v287_v24 = vmul.f32 %v545_v9, %v286_v20 }
  0x63   : > { %v547_v25 = vpop.eup %546 }
  0x64   : > { %v284_v27 = vmul.f32 0.6931472, %v547_v25 }
  0x66   : > { %v290_v29 = vsel %vm289_vm2, %v287_v24, %v284_v27 }
  0x67   : > { %v292_v30 = vcombine.high %v290_v29, %v290_v29  ;;  %v294_v31 = vadd.f32 %v290_v29, %v280_v26 }
  0x69   : > { %v295_v32 = vadd.f32 %v292_v30, %v281_v28  ;;  %v296_v33 = vsub.f32 0.0, %v294_v31 }
  0x6b   : > { %v297_v34 = vsub.f32 0.0, %v295_v32  ;;  %v298_v35 = vmul.f32 1.442695, %v296_v33 }
  0x6d   : > { %548 = vpow2.f32 %v298_v35  ;;  %v300_v36 = vmul.f32 1.442695, %v297_v34 }
  0x6f   : > { %550 = vpow2.f32 %v300_v36 }
  0x7a   : > { %v549_v37 = vpop.eup %548 }
  0x7b   : > { %v302_v38 = vsub.f32 1.0, %v549_v37 }
  0x7c   : > { %v551_v39 = vpop.eup %550 }
  0x7d   : > { %v303_v40 = vsub.f32 1.0, %v551_v39  ;;  %v304_v41 = vmul.f32 %v302_v38, %v302_v38 }
  0x7f   : > { %v305_v44 = vmul.f32 %v303_v40, %v303_v40  ;;  %v306_v45 = vmul.f32 %v304_v41, %v302_v38  ;;  %v308_v46 = vmul.f32 %v304_v41, %v294_v31 }
  0x81   : > { %v307_v48 = vmul.f32 %v305_v44, %v303_v40  ;;  %v309_v49 = vmul.f32 %v305_v44, %v295_v32  ;;  %v312_v50 = vmul.f32 %v310_v43, %v308_v46 }
  0x83   : > { %v313_v51 = vmul.f32 %v311_v47, %v309_v49  ;;  %v314_v52 = vadd.f32 %v312_v50, %v306_v45 }
  0x85   : > { %v315_v53 = vadd.f32 %v313_v51, %v307_v48 }
  0x87   : > { %v319_v55 = vcombine.low %v314_v52, %v315_v53  ;;  %327 = sbr.rel (!%p323_p12) target bundleno = 354 (0x162), region = 44 }
  0x89   : > { %v321_v56 = vadd.f32 %v319_v55, %v316_v54 }
  0x8b   : > { %322 = vst [vmem:[#allocation2] sm:$0xff] %v321_v56 }
  0x92   : > { %v328_v57 = vld [vmem:[#allocation2] sm:$0xff] }
  0x93   : > { %v330_v58 = vcombine.high %v328_v57, %v328_v57  ;;  %v333_v59 = vsel %vm332_vm3, %v328_v57, 0.0 }
  0x95   : > { %v334_v60 = vsel %vm332_vm3, %v330_v58, 0.0 }
  0x96   : > { %v335_v61 = vadd.f32 %v334_v60, %v333_v59 }
  0x98   : > { %336 = vadd.xlane.f32.xlu0 %v335_v61 }
 0x121   : > { %v337_v62 = vpop.xlane.xlu0 %336 }
 0x122   : > { %v338_v63 = vrot.slane %v337_v62, 4 }
 0x124   : > { %v339_v0 = vadd.f32 %v338_v63, %v337_v62 }
 0x126   : > { %v340_v1 = vrot.slane %v339_v0, 2 }
 0x128   : > { %v341_v2 = vadd.f32 %v340_v1, %v339_v0 }
 0x12a   : > { %v342_v3 = vrot.slane %v341_v2, 1 }
 0x12c   : > { %v343_v4 = vadd.f32 %v342_v3, %v341_v2 }
 0x12e   : > { %472 = vpush %v343_v4 }
 0x15f   : > { %s473_s20 = spop %472 }
 0x160   : > { %v345_v5 = vstv %s473_s20 }
 0x161   : > { %347 = vst.msk [vmem:[#allocation8] sm:$0x1] %vm346_vm4, %v345_v5 }
 0x162 PF: > { %p830_p7 = scmp.eq.s32.totalorder %s450_s15, 1  ;;  %s697_s30 = smov [#allocation8]  }
 0x163   : > { %s357_s8 = sshll.u32 %s697_s30, 4  ;;  %s358_s8 = int_to_ptr.vmem [resolvable:$true] %s357_s8 }
 0x164   : > { %s609_s18 = scalar_lea.vmem %s358_s8, 16  ;;  %s615_s19 = scalar_lea.vmem %s358_s8, 32 }
 0x165   : > { %p610_p3 = scmp.ne.s32.totalorder %s358_s8, %s609_s18  ;;  %p616_p6 = scmp.lt.s32.totalorder %s358_s8, %s358_s8 }
 0x166   : > { %p617_p8 = scmp.lt.s32.totalorder %s615_s19, %s609_s18 }
 0x167   : > { %p611_p4 = pnand %p610_p3, %p830_p7 }
 0x168   : > { %p618_p13 = por %p617_p8, %p616_p6 }
 0x169   : > { %p612_p5 = pneg %p611_p4 }
 0x16b   : > { %p619_p0 = pnand %p618_p13, %p612_p5 }
 0x16d   : > { %622 = shalt.err (!%p619_p0)
}
 0x16e   : > { %479 = dma.vmem_to_hbm [thread:$0]  (%p830_p7), %s358_s8, 16, %s865_s2, [#allocation5]  }
 0x16f   : > { %666 = dma.done.wait (%p830_p7), [#allocation5], 16  }
 0x170   : > { %668 = vsyncadd (%p830_p7), [#allocation5], 4294967280 }
 0x171 PF: > { %s19_s14 = sadd.s32 1, %s691_s14   ;;  %s871_s9 = smov %s675_s10 }
 0x172   : > { %p16_p10 = scmp.ge.s32.totalorder %s19_s14, 4   ;;  %s872_s10 = smov %s679_s11 }
 0x173   : > { %s873_s11 = smov %s764_s21  ;;  %s874_s12 = smov %s687_s13 }
 0x174   : > { %s875_s13 = smov %s877_s16  ;;  %18 = sbr.rel (!%p16_p10) target bundleno = 7 (0x7), region = 87 }
 0x179   :  { %370 = vsyncpa [#allocation4], 1 }
 0x17a   :  { %372 = vsyncpa [#allocation4 + $0x1], 1 }
 0x17b   :  { %373 = vsyncpa [#allocation7], 1 }
 0x17c   :  { %375 = vsyncpa [#allocation7 + $0x1], 1 }
 0x17d   :  { %376 = vsyncpa [#allocation5], 1 }
 0x17e   :  { %378 = vsyncpa [#allocation5 + $0x1], 1 }

</bundles_post_ra>
